<compile_context>
chip_gen: v7x
topology: tpu7x:2x2x1
jax: 0.10.0
libtpu: 0.0.40
codegen_flags: <defaults>
</compile_context>

<pallas_src>
import math

import jax
import jax.numpy as jnp
from jax.experimental import pallas as pl
from jax.experimental.pallas import tpu as pltpu


def _round_up(x: int, n: int) -> int:
    return ((x + n - 1) // n) * n


def _hw_budgets():
    """Generation-aware VMEM budgets (trace-time query, safe fallback)."""
    vmem_phys = 64 * 1024 * 1024          # conservative default (v7x-class)
    try:
        vmem_phys = int(pltpu.get_tpu_info().vmem_capacity_bytes)
    except Exception:
        pass
    if vmem_phys >= 100 * 1024 * 1024:
        # v5e / v6e class: 128 MiB VMEM, a single TensorCore per chip.
        return dict(input_budget=40 * 1024 * 1024,
                    vmem_cap=96 * 1024 * 1024,
                    two_cores=False)
    # 64 MiB-class VMEM (v7x): smaller blocks, 2 TensorCores share HBM.
    return dict(input_budget=12 * 1024 * 1024,
                vmem_cap=40 * 1024 * 1024,
                two_cores=True)


def _choose_tiles(k, m, itemsize, needs_cast, max_lane_tile,
                  input_vmem_budget_bytes, two_cores):
    """Pick (lane_tile, k_tile) sized for HBM bandwidth + the VMEM budget."""
    pack = max(8, 32 // itemsize)         # sublane packing: 8/16/32 for 4/2/1 B
    lane_tile = min(max_lane_tile, _round_up(m, 128))

    if two_cores and m > 512:
        # v7x only: keep >= 2 lane steps so both TensorCores drive DMA, and
        # prefer an even step count (avoid a 2:1 core imbalance).
        steps = pl.cdiv(m, lane_tile)
        if steps < 2:
            lane_tile = max(256, _round_up(pl.cdiv(m, 2), 128))
        elif steps % 2 == 1:
            cand = max(256, _round_up(pl.cdiv(m, steps + 1), 128))
            if pl.cdiv(m, cand) % 2 == 0:
                lane_tile = cand

    # K tile: as much as fits the double-buffered input-block budget (plus one
    # opmath-cast copy for reduced-precision inputs), rounded to the packed
    # sublane count.  The (possibly) ragged last block is masked in-kernel.
    bytes_per_row = lane_tile * (2 * itemsize + (4 if needs_cast else 0))
    max_tk = max(pack, (input_vmem_budget_bytes // bytes_per_row) // pack * pack)
    tk = min(_round_up(k, pack), max_tk)
    return lane_tile, tk


def _make_sum0_kernel(k_total: int, tk: int, acc_dtype):
    ragged_k = (k_total % tk) != 0
    n_sub = tk // 8                       # tk is always a multiple of 8

    def fold8(v):
        # (tk, lane) -> (8, lane): pure-view reshape + whole-vreg VPU adds,
        # keeping the accumulator fully sublane-dense (no per-block XLU reduce).
        return v.reshape(n_sub, 8, v.shape[-1]).sum(axis=0)

    def kernel(x_ref, o_ref, acc_ref):
        ki = pl.program_id(1)
        nk = pl.num_programs(1)

        @pl.when(ki == 0)
        def _():
            acc_ref[...] = jnp.zeros_like(acc_ref)

        x = x_ref[...].astype(acc_dtype)

        if ragged_k:
            # Only the last K block can be ragged: keep the iota/compare/select
            # off the hot path.
            @pl.when(ki != nk - 1)
            def _():
                acc_ref[...] += fold8(x)

            @pl.when(ki == nk - 1)
            def _():
                row = jax.lax.broadcasted_iota(jnp.int32, x.shape, 0)
                xm = jnp.where(row < (k_total - ki * tk), x, jnp.zeros_like(x))
                acc_ref[...] += fold8(xm)
        else:
            acc_ref[...] += fold8(x)

        @pl.when(ki == nk - 1)
        def _():
            # Single cross-sublane reduce + 1-row store per lane step.
            o_ref[...] = jnp.sum(acc_ref[...], axis=0,
                                 keepdims=True).astype(o_ref.dtype)

    return kernel


def analog_accumulator(
    x: jax.Array,
    *,
    max_lane_tile: int = 2048,
    input_vmem_budget_bytes=None,
    small_input_bytes: int = 256 * 1024,
    fold_target: int = 1024,
) -> jax.Array:
    """Pallas implementation of torch.sum(x, 0)."""
    if x.ndim < 1:
        raise ValueError("input must have at least 1 dimension")

    k = x.shape[0]
    rest_shape = x.shape[1:]
    m = math.prod(rest_shape) if rest_shape else 1

    # Output dtype: exactly what jnp.sum(x, 0) would give (keeps the XLA fast
    # paths and the Pallas path consistent), clamped to 32-bit (TPU-native).
    out_dtype = jax.eval_shape(lambda a: jnp.sum(a, axis=0),
                               jax.ShapeDtypeStruct(x.shape, x.dtype)).dtype
    if jnp.dtype(out_dtype).itemsize > 4:
        out_dtype = {"f": jnp.float32, "i": jnp.int32, "u": jnp.uint32}.get(
            jnp.dtype(out_dtype).kind, jnp.float32)
    # TODO(synk): torch.sum promotes integer inputs to int64; the TPU kernel
    # accumulates in 32-bit, so very large K with wide integer inputs can wrap.

    if m == 0 or k == 0:
        return jnp.zeros(rest_shape, dtype=out_dtype)

    itemsize = jnp.dtype(x.dtype).itemsize

    # Small-input fast path: Pallas launch/DMA setup dominates; let XLA fuse it.
    if k * m * itemsize <= small_input_bytes:
        return jnp.sum(x, axis=0).astype(out_dtype)

    acc_dtype = jnp.float32 if jnp.issubdtype(x.dtype, jnp.floating) else jnp.int32

    # Narrow feature axis: fold K into the lane axis, (K, M) -> (K/F, F*M), so
    # DMA rows stay lane-dense; a tiny (F, M) sum finishes in XLA.
    fold_f = 1
    if 0 < m < fold_target and k > 1:
        f_cap = min(k, max(1, max_lane_tile // m))
        divs = [f for f in range(2, f_cap + 1) if k % f == 0]
        good = [f for f in divs if f * m >= fold_target]
        if good:
            fold_f = min(good)
        elif divs:
            fold_f = max(divs)
    k_eff = k // fold_f
    m_eff = m * fold_f

    # Still too narrow for a lane-dense tile even after folding: plain XLA.
    if m_eff < 128:
        return jnp.sum(x, axis=0).astype(out_dtype)

    x2d = x.reshape(k_eff, m_eff)
    if itemsize > 4:                      # 64-bit inputs: pre-cast to 32-bit opmath
        x2d = x2d.astype(acc_dtype)
        itemsize = 4
    needs_cast = jnp.dtype(x2d.dtype) != jnp.dtype(acc_dtype)

    budgets = _hw_budgets()
    if input_vmem_budget_bytes is None:
        input_vmem_budget_bytes = budgets["input_budget"]

    lane_tile, tk = _choose_tiles(k_eff, m_eff, itemsize, needs_cast,
                                  max_lane_tile, input_vmem_budget_bytes,
                                  budgets["two_cores"])
    grid = (pl.cdiv(m_eff, lane_tile), pl.cdiv(k_eff, tk))

    kernel_out_dtype = acc_dtype if fold_f > 1 else out_dtype
    out_itemsize = jnp.dtype(kernel_out_dtype).itemsize

    # VMEM limit derived from the chosen tiles (instead of a hard-coded value).
    vmem_limit = (2 * tk * lane_tile * itemsize          # double-buffered input
                  + (tk * lane_tile * 4 if needs_cast else 0)  # opmath headroom
                  + 2 * lane_tile * out_itemsize         # double-buffered output
                  + 8 * lane_tile * 4                    # accumulator scratch
                  + 2 * 1024 * 1024)                     # misc headroom
    vmem_limit = int(min(budgets["vmem_cap"],
                         max(8 * 1024 * 1024, _round_up(vmem_limit, 1 << 20))))

    out2d = pl.pallas_call(
        _make_sum0_kernel(k_eff, tk, acc_dtype),
        out_shape=jax.ShapeDtypeStruct((1, m_eff), kernel_out_dtype),
        grid_spec=pltpu.PrefetchScalarGridSpec(
            num_scalar_prefetch=0,
            grid=grid,
            in_specs=[pl.BlockSpec((tk, lane_tile), lambda j, ki: (ki, j))],
            out_specs=pl.BlockSpec((1, lane_tile), lambda j, ki: (0, j)),
            scratch_shapes=[pltpu.VMEM((8, lane_tile), acc_dtype)],
        ),
        compiler_params=pltpu.CompilerParams(
            dimension_semantics=("parallel", "arbitrary"),
            vmem_limit_bytes=vmem_limit,
        ),
    )(x2d)

    if fold_f > 1:
        out = jnp.sum(out2d.reshape(fold_f, m), axis=0).astype(out_dtype)
        return out.reshape(rest_shape)
    return out2d.reshape(rest_shape).astype(out_dtype)


if __name__ == "__main__":
    key = jax.random.PRNGKey(0)
    k0, k1, k2, k3, k4, k5 = jax.random.split(key, 6)

    # 1) Module-sized input (2 analog partial sums of an NCHW feature map);
    #    force the Pallas path.
    x = jax.random.normal(k0, (2, 4, 16, 16), dtype=jnp.float32)
    out = jax.block_until_ready(analog_accumulator(x, small_input_bytes=0))
    ref = jnp.sum(x, axis=0)
    assert out.shape == ref.shape, (out.shape, ref.shape)
    assert out.dtype == ref.dtype, (out.dtype, ref.dtype)
    assert jnp.allclose(out, ref, atol=1e-6, rtol=1e-6)

    # 2) Ragged feature dim (M % 128 != 0), odd K -> ragged lane + ragged K block.
    x2 = jax.random.normal(k1, (11, 3, 9, 37), dtype=jnp.float32)
    out2 = jax.block_until_ready(analog_accumulator(x2, small_input_bytes=0))
    ref2 = jnp.sum(x2, axis=0)
    assert out2.shape == ref2.shape
    assert jnp.allclose(out2, ref2, atol=1e-5, rtol=1e-5)

    # 3) Force K tiling + ragged-K masking via a tiny input VMEM budget.
    x3 = jax.random.normal(k2, (13, 8, 16, 16), dtype=jnp.float32)
    out3 = jax.block_until_ready(
        analog_accumulator(x3, small_input_bytes=0, input_vmem_budget_bytes=4096))
    assert jnp.allclose(out3, jnp.sum(x3, axis=0), atol=1e-5, rtol=1e-5)

    # 4) bf16 input: f32 accumulation inside the kernel, output dtype preserved.
    x4 = jax.random.normal(k3, (6, 4, 16, 20), dtype=jnp.bfloat16)
    out4 = jax.block_until_ready(analog_accumulator(x4, small_input_bytes=0))
    ref4 = jnp.sum(x4.astype(jnp.float32), axis=0).astype(jnp.bfloat16)
    assert out4.dtype == jnp.bfloat16
    assert jnp.allclose(out4.astype(jnp.float32), ref4.astype(jnp.float32),
                        atol=1e-2, rtol=1e-2)

    # 5) Narrow feature dim (M=128) -> K folded into the lane axis.
    x5 = jax.random.normal(k4, (16, 2, 8, 8), dtype=jnp.float32)
    out5 = jax.block_until_ready(analog_accumulator(x5, small_input_bytes=0))
    assert jnp.allclose(out5, jnp.sum(x5, axis=0), atol=1e-5, rtol=1e-5)

    # 6) int8 input: int32 accumulation/return (same dtype as jnp.sum on all paths).
    x6 = jax.random.randint(k5, (5, 4, 16, 16), -100, 100,
                            dtype=jnp.int32).astype(jnp.int8)
    out6 = jax.block_until_ready(analog_accumulator(x6, small_input_bytes=0))
    ref6 = jnp.sum(x6, axis=0)
    assert out6.dtype == ref6.dtype, (out6.dtype, ref6.dtype)
    assert jnp.array_equal(out6, ref6)

    # 7) Small-input fast path (plain XLA) sanity check.
    out7 = jax.block_until_ready(analog_accumulator(x))
    assert jnp.allclose(out7, ref, atol=1e-6, rtol=1e-6)

    print("KERNEL_OK")
</pallas_src>

<mosaic_0001>
module attributes {stable_mosaic.version = 11 : i64} {
  func.func @kernel(%arg0: i32, %arg1: i32, %arg2: memref<8x512xf32, #tpu.memory_space<vmem>>, %arg3: memref<1x512xf32, #tpu.memory_space<vmem>>, %arg4: memref<8x512xf32, #tpu.memory_space<vmem>>) attributes {dimension_semantics = [#tpu.dimension_semantics<parallel>, #tpu.dimension_semantics<arbitrary>], iteration_bounds = array<i64: 2, 1>, scalar_prefetch = 0 : i64, scratch_operands = 1 : i64, tpu.core_type = #tpu.core_type<tc>, window_params = [{transform_indices = @transform_0, window_bounds = array<i64: 8, 512>}, {transform_indices = @transform_1, window_bounds = array<i64: 1, 512>}]} {
    %c0_i32 = arith.constant 0 : i32
    %0 = arith.cmpi eq, %arg1, %c0_i32 : i32
    %1 = arith.extui %0 : i1 to i32
    %c0_i32_0 = arith.constant 0 : i32
    %2 = arith.cmpi ne, %1, %c0_i32_0 : i32
    scf.if %2 {
      %cst = arith.constant 0.000000e+00 : f32
      %13 = vector.broadcast %cst : f32 to vector<8x512xf32>
      %c0_8 = arith.constant 0 : index
      %c0_9 = arith.constant 0 : index
      %14 = vector.load %arg4[%c0_8, %c0_9] : memref<8x512xf32, #tpu.memory_space<vmem>>, vector<8x512xf32>
      tpu.vector_store %arg4[%c0_8, %c0_9], %13 {strides = array<i32>} : memref<8x512xf32, #tpu.memory_space<vmem>>, vector<8x512xf32>,
    } else {
    }
    %c0 = arith.constant 0 : index
    %c0_1 = arith.constant 0 : index
    %3 = vector.load %arg2[%c0, %c0_1] : memref<8x512xf32, #tpu.memory_space<vmem>>, vector<8x512xf32>
    %c0_i32_2 = arith.constant 0 : i32
    %4 = arith.cmpi ne, %arg1, %c0_i32_2 : i32
    %5 = arith.extui %4 : i1 to i32
    %c0_i32_3 = arith.constant 0 : i32
    %6 = arith.cmpi ne, %5, %c0_i32_3 : i32
    scf.if %6 {
      %c0_8 = arith.constant 0 : index
      %c0_9 = arith.constant 0 : index
      %13 = vector.load %arg4[%c0_8, %c0_9] : memref<8x512xf32, #tpu.memory_space<vmem>>, vector<8x512xf32>
      %14 = vector.shape_cast %3 : vector<8x512xf32> to vector<1x8x512xf32>
      %cst = arith.constant dense<0.000000e+00> : vector<8x512xf32>
      %15 = vector.multi_reduction <add>, %14, %cst [0] : vector<1x8x512xf32> to vector<8x512xf32>
      %16 = arith.addf %13, %15 : vector<8x512xf32>
      %c0_10 = arith.constant 0 : index
      %c0_11 = arith.constant 0 : index
      %17 = vector.load %arg4[%c0_10, %c0_11] : memref<8x512xf32, #tpu.memory_space<vmem>>, vector<8x512xf32>
      tpu.vector_store %arg4[%c0_10, %c0_11], %16 {strides = array<i32>} : memref<8x512xf32, #tpu.memory_space<vmem>>, vector<8x512xf32>,
    } else {
    }
    %c0_i32_4 = arith.constant 0 : i32
    %7 = arith.cmpi eq, %arg1, %c0_i32_4 : i32
    %8 = arith.extui %7 : i1 to i32
    %c0_i32_5 = arith.constant 0 : i32
    %9 = arith.cmpi ne, %8, %c0_i32_5 : i32
    scf.if %9 {
      %13 = tpu.iota {dimensions = array<i32: 0>} : vector<8x512xi32>
      %c8_i32 = arith.constant 8 : i32
      %14 = arith.muli %arg1, %c8_i32 : i32
      %c2_i32 = arith.constant 2 : i32
      %15 = arith.subi %c2_i32, %14 : i32
      %16 = vector.broadcast %15 : i32 to vector<8x512xi32>
      %17 = arith.cmpi slt, %13, %16 : vector<8x512xi32>
      %cst = arith.constant 0.000000e+00 : f32
      %18 = vector.broadcast %cst : f32 to vector<8x512xf32>
      %19 = arith.select %17, %3, %18 : vector<8x512xi1>, vector<8x512xf32>
      %c0_8 = arith.constant 0 : index
      %c0_9 = arith.constant 0 : index
      %20 = vector.load %arg4[%c0_8, %c0_9] : memref<8x512xf32, #tpu.memory_space<vmem>>, vector<8x512xf32>
      %21 = vector.shape_cast %19 : vector<8x512xf32> to vector<1x8x512xf32>
      %cst_10 = arith.constant dense<0.000000e+00> : vector<8x512xf32>
      %22 = vector.multi_reduction <add>, %21, %cst_10 [0] : vector<1x8x512xf32> to vector<8x512xf32>
      %23 = arith.addf %20, %22 : vector<8x512xf32>
      %c0_11 = arith.constant 0 : index
      %c0_12 = arith.constant 0 : index
      %24 = vector.load %arg4[%c0_11, %c0_12] : memref<8x512xf32, #tpu.memory_space<vmem>>, vector<8x512xf32>
      tpu.vector_store %arg4[%c0_11, %c0_12], %23 {strides = array<i32>} : memref<8x512xf32, #tpu.memory_space<vmem>>, vector<8x512xf32>,
    } else {
    }
    %c0_i32_6 = arith.constant 0 : i32
    %10 = arith.cmpi eq, %arg1, %c0_i32_6 : i32
    %11 = arith.extui %10 : i1 to i32
    %c0_i32_7 = arith.constant 0 : i32
    %12 = arith.cmpi ne, %11, %c0_i32_7 : i32
    scf.if %12 {
      %c0_8 = arith.constant 0 : index
      %c0_9 = arith.constant 0 : index
      %13 = vector.load %arg4[%c0_8, %c0_9] : memref<8x512xf32, #tpu.memory_space<vmem>>, vector<8x512xf32>
      %cst = arith.constant dense<0.000000e+00> : vector<512xf32>
      %14 = vector.multi_reduction <add>, %13, %cst [0] : vector<8x512xf32> to vector<512xf32>
      %15 = vector.shape_cast %14 : vector<512xf32> to vector<1x512xf32>
      %c0_10 = arith.constant 0 : index
      %c0_11 = arith.constant 0 : index
      %16 = vector.load %arg3[%c0_10, %c0_11] : memref<1x512xf32, #tpu.memory_space<vmem>>, vector<1x512xf32>
      tpu.vector_store %arg3[%c0_10, %c0_11], %15 {strides = array<i32>} : memref<1x512xf32, #tpu.memory_space<vmem>>, vector<1x512xf32>,
    } else {
    }
    return
  }
  func.func @transform_0(%arg0: i32, %arg1: i32) -> (i32, i32) {
    %c0_i32 = arith.constant 0 : i32
    return %arg1, %arg0 : i32, i32
  }
  func.func @transform_1(%arg0: i32, %arg1: i32) -> (i32, i32) {
    %c0_i32 = arith.constant 0 : i32
    %c0_i32_0 = arith.constant 0 : i32
    return %c0_i32, %arg0 : i32, i32
  }
}

</mosaic_0001>

<bundles_post_ra>
// kernel: tpu_custom_call.1
= control target key start
LH: loop header
LB: loop body
LE: loop exit
PB: predicated region body
PF: predicated region fallthrough
CT: control target
= control target key end

     0   :  { %6 = vsyncpa [#allocation4], 0  ;;  %s833_s0 = inlined_call_operand.hbm [shape: f32[2,1024], index: 0, kind: input, shape index: {}]   ;;  %s834_s1 = inlined_call_operand.hbm [shape: f32[1,1024], index: 1, kind: output, shape index: {}]  }
   0x1   :  { %8 = vsyncpa [#allocation4 + $0x1], 0 }
   0x2   :  { %9 = vsyncpa [#allocation5], 0 }
   0x3   :  { %11 = vsyncpa [#allocation5 + $0x1], 0  ;;  %s679_s6 = smov 0   ;;  %s681_s7 = smov 0  }
   0x4   :  { %s683_s8 = smov 0   ;;  %s685_s9 = smov 0  }
   0x5   :  { %s687_s10 = smov 0   ;;  %s689_s11 = smov 0  }
   0x6 LB: > { %s470_s12 = sadd.s32 4294967295, %s660_s11   ;;  %s471_s13 = sadd.s32 4294967294, %s660_s11   ;;  %s660_s11 = sphi %s689_s11, %s17_s11   ;;  %s656_s10 = sphi %s687_s10, %s845_s10   ;;  %s652_s9 = sphi %s685_s9, %s844_s9   ;;  %s648_s8 = sphi %s683_s8, %s843_s8   ;;  %s644_s7 = sphi %s681_s7, %s842_s7   ;;  %s640_s6 = sphi %s679_s6, %s841_s6  }
   0x7   : > { %s29_s14 = sadd.s32 1, %s656_s10  ;;  %s38_s15 = sadd.s32 1, %s648_s8 }
   0x8   : > { %p31_p0 = scmp.ge.s32.totalorder %s29_s14, 2  ;;  %p45_p1 = scmp.ne.s32.totalorder %s648_s8, %s644_s7 }
   0x9   : > { %p46_p2 = scmp.eq.s32.totalorder %s660_s11, 0  ;;  %p51_p3 = scmp.ne.s32.totalorder %s644_s7, %s640_s6 }
   0xa   : > { %s847_s14 = smov (%p31_p0, %s29_s14), 0  ;;  %p52_p5 = scmp.eq.s32.totalorder %s470_s12, 0 }
   0xb   : > { %p47_p4 = por %p46_p2, %p45_p1  ;;  %s34_s16 = ssub.s32 %s656_s10, %s847_s14 }
   0xc   : > { %p75_p6 = scmp.eq.s32.totalorder %s470_s12, 1  ;;  %p36_p7 = scmp.eq.s32.totalorder %s34_s16, 0 }
   0xd   : > { %p722_p8 = por %p52_p5, %p51_p3  ;;  %p81_p10 = scmp.eq.s32.totalorder %s471_s13, 1 }
   0xe   : > { %p726_p9 = por %p75_p6, %p45_p1  ;;  %p835_p12 = scmp.ge.s32.totalorder %s660_s11, 2 }
   0xf   : > { %s731_s19 = scalar_select %p36_p7, %s648_s8, %s38_s15  }
  0x10   : > { %p733_p11 = por %p81_p10, %p51_p3  ;;  %97 = sbr.rel (%p835_p12) target bundleno = 55 (0x37), region = 16 }
  0x12   : > { %s838_s20 = scalar_select %p733_p11, 1, 0 }
  0x17   : > { %100 = sbr.rel (!%p47_p4) target bundleno = 55 (0x37), region = 20  ;;  %s101_s21 = sand.u32 (%p47_p4), 1, %s648_s8  }
  0x18   : > { %s474_s22 = sshll.u32 (%p47_p4), %s101_s21, 5  ;;  %s741_s23 = scalar_lea.sflag (%p47_p4), [#allocation4], %s101_s21 }
  0x19   : > { %s105_s24 = scalar_lea.vmem (%p47_p4), [#allocation3], %s474_s22 }
  0x1e   : > { %113 = vsyncadd %s741_s23, 384  ;;  %s485_s25 = sshll.u32 %s656_s10, 7  ;;  %s120_s26 = sshll.u32 %s105_s24, 4  ;;  %s750_s26 = int_to_ptr.vmem [resolvable:$true] %s120_s26 }
  0x1f   : > { %s748_s29 = scalar_lea.hbm %s833_s0, %s485_s25  ;;  %s556_s4 = scalar_lea.hbm %s833_s0, 256 }
  0x20   : > { %s554_s30 = scalar_lea.hbm %s748_s29, 128  ;;  %p557_p0 = scmp.lt.u32.totalorder %s748_s29, %s833_s0 }
  0x21   : > { %p555_p13 = scmp.ne.s32.totalorder %s748_s29, %s554_s30  ;;  %p558_p1 = scmp.lt.u32.totalorder %s556_s4, %s554_s30 }
  0x22   : > { %p560_p3 = scmp.lt.u32.totalorder %s554_s30, %s748_s29 }
  0x23   : > { %p559_p2 = por %p558_p1, %p557_p0 }
  0x25   : > { %p561_p4 = por %p560_p3, %p559_p2 }
  0x27   : > { %p562_p5 = pnand %p561_p4, %p555_p13 }
  0x29   : > { %565 = shalt.err (!%p562_p5)
}
  0x2a   : > { %s566_s13 = scalar_lea.vmem %s750_s26, 128  ;;  %s662_s15 = smov [#allocation3]  }
  0x2b   : > { %p567_p6 = scmp.ne.s32.totalorder %s750_s26, %s566_s13  ;;  %s568_s16 = sshll.u32 %s662_s15, 4  ;;  %s569_s16 = int_to_ptr.vmem [resolvable:$false] %s568_s16 }
  0x2c   : > { %s570_s21 = scalar_lea.vmem %s569_s16, 1024  ;;  %p571_p7 = scmp.lt.s32.totalorder %s750_s26, %s569_s16 }
  0x2d   : > { %p572_p10 = scmp.lt.s32.totalorder %s570_s21, %s566_s13 }
  0x2f   : > { %p573_p12 = por %p572_p10, %p571_p7 }
  0x31   : > { %p574_p11 = pnand %p573_p12, %p567_p6 }
  0x33   : > { %577 = shalt.err (!%p574_p11)
}
  0x34   : > { %s663_s22 = smov 256   ;;  %s664_s24 = smov 128  }
  0x35   : > { %s665_s25 = smov 8  }
  0x36   : > { %126 = dma.hbm_to_vmem [thread:$0]  %s748_s29, 128, %s750_s26, %s741_s23, %s663_s22, %s664_s24, %s665_s25  }
  0x37 PF: > { %p477_p13 = scmp.ge.s32.totalorder %s660_s11, 1  ;;  %p128_p0 = scmp.lt.s32.totalorder %s660_s11, 3 }
  0x39   : > { %p129_p1 = pnand %p477_p13, %p128_p0 }
  0x3a   : > { %s771_s27 = sand.u32 (!%p129_p1), 1, %s644_s7  }
  0x3b   : > { %132 = sbr.rel (%p129_p1) target bundleno = 113 (0x71), region = 24  ;;  %s478_s28 = sshll.u32 (!%p129_p1), %s771_s27, 5 }
  0x3c   : > { %s135_s30 = scalar_lea.sflag (!%p129_p1), [#allocation4], %s771_s27  ;;  %s138_s2 = scalar_lea.vmem (!%p129_p1), [#allocation3], %s478_s28 }
  0x42   : > { %631 = dma.done.wait (%p722_p8), %s135_s30, 512  }
  0x43   : > { %633 = vsyncadd (%p722_p8), %s135_s30, 4294966784  ;;  %v242_v0 = vlaneseq  ;;  %v666_v1 = vmov 1983009808   ;;  %v548_v6 = vld [vmem:[%s138_s2] ss:$8 sps:$4 sm:$0xff]   ;;  %s479_s17 = sshll.u32 %s771_s27, 2 }
  0x44   : > { %v257_v2 = vunpack.c.l.s4 %v666_v1  ;;  %v550_v7 = vld [vmem:[%s138_s2 + $0x4] ss:$8 sps:$4 sm:$0xff]   ;;  %v551_v8 = vld [vmem:[%s138_s2 + $0x10] ss:$8 sps:$4 sm:$0xff]   ;;  %v553_v9 = vld [vmem:[%s138_s2 + $0x14] ss:$8 sps:$4 sm:$0xff]  }
  0x45   : > { %v243_v3 = vshrl.u32 %v242_v0, 7  ;;  %v667_v26 = vmov 1966171168   ;;  %s156_s23 = scalar_lea.vmem [#allocation6], %s479_s17  ;;  %s486_s29 = sshll.u32 %s652_s9, 6  ;;  %vm371_vm1 = vcmp.lt.s32.totalorder %v242_v0, 512 }
  0x46   : > { %v258_v4 = vunpack.c.0.s8 %v257_v2  ;;  %v347_v27 = vunpack.c.l.s4 %v667_v26  ;;  %s389_s26 = sshll.u32 %s156_s23, 4  ;;  %s786_s5 = scalar_lea.hbm %s834_s1, %s486_s29  ;;  %s781_s26 = int_to_ptr.vmem [resolvable:$true] %s389_s26 }
  0x47   : > { %vm247_vm0 = vcmp.lt.s32.totalorder %v243_v3, 2  ;;  %s375_s12 = scalar_lea.sflag [#allocation5], %s771_s27  ;;  %s578_s13 = scalar_lea.vmem %s781_s26, 64 }
  0x48   : > { %v261_v5 = vsub.s32 %v258_v4, %v243_v3  ;;  %v348_v36 = vunpack.c.0.s8 %v347_v27  ;;  %p579_p8 = scmp.ne.s32.totalorder %s781_s26, %s578_s13  ;;  %s668_s9 = smov [#allocation6]  }
  0x49   : > { %s582_s15 = sshll.u32 %s668_s9, 4  ;;  %s583_s15 = int_to_ptr.vmem [resolvable:$false] %s582_s15 }
  0x4a   : > { %v262_v10 = vrot.slane %v548_v6, %v261_v5  ;;  %v269_v11 = vrot.slane %v550_v7, %v261_v5  ;;  %v276_v12 = vrot.slane %v551_v8, %v261_v5  ;;  %v283_v13 = vrot.slane %v553_v9, %v261_v5  ;;  %p580_p11 = pnand %p579_p8, %p726_p9  ;;  %s584_s16 = scalar_lea.vmem %s583_s15, 128 }
  0x4b   : > { %v351_v45 = vsub.s32 %v348_v36, %v243_v3  ;;  %p585_p2 = scmp.lt.s32.totalorder %s781_s26, %s583_s15  ;;  %p586_p3 = scmp.lt.s32.totalorder %s584_s16, %s578_s13 }
  0x4c   : > { %v284_v14 = vcombine.low %v262_v10, %v276_v12  ;;  %v285_v15 = vcombine.high %v262_v10, %v276_v12  ;;  %v286_v16 = vcombine.low %v269_v11, %v283_v13  ;;  %v287_v17 = vcombine.high %v269_v11, %v283_v13  ;;  %p581_p12 = pneg %p580_p11 }
  0x4d   : > { %p587_p4 = por %p586_p3, %p585_p2 }
  0x4e   : > { %v292_v18 = vsel %vm247_vm0, %v284_v14, 0.0  ;;  %v293_v19 = vsel %vm247_vm0, %v285_v15, 0.0  ;;  %v294_v20 = vsel %vm247_vm0, %v286_v16, 0.0  ;;  %v295_v21 = vsel %vm247_vm0, %v287_v17, 0.0 }
  0x4f   : > { %v316_v22 = vrot.slane %v292_v18, 4  ;;  %v322_v23 = vrot.slane %v293_v19, 4  ;;  %v328_v24 = vrot.slane %v294_v20, 4  ;;  %v334_v25 = vrot.slane %v295_v21, 4  ;;  %p588_p5 = pnand %p587_p4, %p581_p12 }
  0x51   : > { %v317_v28 = vadd.f32 %v316_v22, %v292_v18  ;;  %v323_v29 = vadd.f32 %v322_v23, %v293_v19  ;;  %v329_v30 = vadd.f32 %v328_v24, %v294_v20  ;;  %v335_v31 = vadd.f32 %v334_v25, %v295_v21 }
  0x53   : > { %v318_v32 = vrot.slane %v317_v28, 2  ;;  %v324_v33 = vrot.slane %v323_v29, 2  ;;  %v330_v34 = vrot.slane %v329_v30, 2  ;;  %v336_v35 = vrot.slane %v335_v31, 2 }
  0x55   : > { %v319_v37 = vadd.f32 %v318_v32, %v317_v28  ;;  %v325_v38 = vadd.f32 %v324_v33, %v323_v29  ;;  %v331_v39 = vadd.f32 %v330_v34, %v329_v30  ;;  %v337_v40 = vadd.f32 %v336_v35, %v335_v31 }
  0x57   : > { %v320_v41 = vrot.slane %v319_v37, 1  ;;  %v326_v42 = vrot.slane %v325_v38, 1  ;;  %v332_v43 = vrot.slane %v331_v39, 1  ;;  %v338_v44 = vrot.slane %v337_v40, 1 }
  0x59   : > { %v321_v46 = vadd.f32 %v320_v41, %v319_v37  ;;  %v327_v47 = vadd.f32 %v326_v42, %v325_v38  ;;  %v333_v48 = vadd.f32 %v332_v43, %v331_v39  ;;  %v339_v49 = vadd.f32 %v338_v44, %v337_v40 }
  0x5b   : > { %v344_v50 = vcombine.low %v321_v46, %v327_v47  ;;  %v345_v51 = vcombine.low %v333_v48, %v339_v49 }
  0x5d   : > { %v352_v52 = vrot.slane %v344_v50, %v351_v45  ;;  %v359_v53 = vrot.slane %v345_v51, %v351_v45 }
  0x5f   : > { %v360_v54 = vcombine.low %v352_v52, %v359_v53 }
  0x61   : > { %v367_v55 = vrot.slane %v360_v54, %v351_v45 }
  0x63   : > { %373 = vst.msk [vmem:[%s156_s23] sm:$0xf] %vm371_vm1, %v367_v55 }
  0x64   : > { %591 = shalt.err (!%p588_p5)
}
  0x65   : > { %s592_s21 = scalar_lea.hbm %s786_s5, 64  ;;  %s596_s25 = scalar_lea.hbm %s834_s1, 128 }
  0x66   : > { %p593_p6 = scmp.ne.s32.totalorder %s786_s5, %s592_s21  ;;  %p597_p13 = scmp.lt.u32.totalorder %s786_s5, %s834_s1 }
  0x67   : > { %p598_p0 = scmp.lt.u32.totalorder %s596_s25, %s592_s21  ;;  %p600_p8 = scmp.lt.u32.totalorder %s592_s21, %s786_s5 }
  0x68   : > { %p594_p7 = pnand %p593_p6, %p726_p9 }
  0x69   : > { %p599_p1 = por %p598_p0, %p597_p13 }
  0x6a   : > { %p595_p10 = pneg %p594_p7 }
  0x6b   : > { %p601_p11 = por %p600_p8, %p599_p1 }
  0x6d   : > { %p602_p12 = pnand %p601_p11, %p595_p10 }
  0x6f   : > { %605 = shalt.err (!%p602_p12)
}
  0x70   : > { %488 = dma.vmem_to_hbm [thread:$0]  (%p726_p9), %s781_s26, 64, %s786_s5, %s375_s12  }
  0x71 PF: > { %s401_s30 = sand.u32 1, %s640_s6   ;;  %p839_p2 = scmp.ne.s32.totalorder %s838_s20, 0 }
  0x72   : > { %p840_p3 = scmp.ge.s32.totalorder %s660_s11, 2  ;;  %s402_s2 = scalar_lea.sflag [#allocation5], %s401_s30 }
  0x74   : > { %p491_p4 = pnand %p840_p3, %p839_p2 }
  0x76   : > { %635 = dma.done.wait (!%p491_p4), %s402_s2, 64  }
  0x77   : > { %637 = vsyncadd (!%p491_p4), %s402_s2, 4294967232  ;;  %s17_s11 = sadd.s32 1, %s660_s11   ;;  %s841_s6 = smov %s644_s7 }
  0x78   : > { %p14_p5 = scmp.ge.s32.totalorder %s17_s11, 4   ;;  %s842_s7 = smov %s648_s8 }
  0x79   : > { %s843_s8 = smov %s731_s19  ;;  %s844_s9 = smov %s656_s10 }
  0x7a   : > { %s845_s10 = smov %s847_s14  ;;  %16 = sbr.rel (!%p14_p5) target bundleno = 6 (0x6), region = 81 }
  0x81   :  { %407 = vsyncpa [#allocation4], 1 }
  0x82   :  { %409 = vsyncpa [#allocation4 + $0x1], 1 }
  0x83   :  { %410 = vsyncpa [#allocation5], 1 }
  0x84   :  { %412 = vsyncpa [#allocation5 + $0x1], 1 }

</bundles_post_ra>
